<compile_context>
chip_gen: v7x
topology: tpu7x:2x2x1
jax: 0.10.0
libtpu: 0.0.40
codegen_flags: <defaults>
</compile_context>

<pallas_src>
import math

import jax
import jax.numpy as jnp
from jax.experimental import pallas as pl
from jax.experimental.pallas import tpu as pltpu


def _round_up(a: int, b: int) -> int:
    return (a + b - 1) // b * b


def _linear_kernel(x_ref, w_ref, b_ref, o_ref):
    # x_ref: (TM, K)   w_ref: (K, N)   b_ref: (1, N)   o_ref: (TM, N)
    acc = jnp.dot(x_ref[...], w_ref[...], preferred_element_type=jnp.float32)
    acc = acc + b_ref[...].astype(jnp.float32)  # bias broadcast over rows, f32
    o_ref[...] = acc.astype(o_ref.dtype)


def linear_embedding(
    x,
    weight,
    bias,
    *,
    tm_cap: int = 2048,
    vmem_budget_bytes: int = 4 * 1024 * 1024,
    min_pallas_rows: int = 0,
):
    """y = x @ weight.T + bias, matching torch.nn.Linear semantics.

    x:      [..., size]
    weight: [dim, size]   (PyTorch layout)
    bias:   [dim]

    min_pallas_rows: if batch*seq is below this, fall back to a plain XLA dot
    (a standalone pallas_call is pure launch overhead at toy sizes). Default 0
    so the Pallas kernel is always exercised; production callers with tiny M
    should set this to ~1024.
    """
    size = x.shape[-1]
    dim = weight.shape[0]
    lead = x.shape[:-1]
    M = math.prod(lead) if lead else 1

    if M < min_pallas_rows:
        return (x.reshape(M, size) @ weight.T + bias).reshape(*lead, dim)

    itemsize = jnp.dtype(x.dtype).itemsize

    # Row tile: multiple of 8 sublanes, sized so the double-buffered x + out tiles
    # fit the VMEM byte budget; never larger than the (8-rounded) problem itself.
    bytes_per_row = 2 * (size + dim) * itemsize  # double-buffered x row + out row
    tm_budget = max(8, vmem_budget_bytes // max(bytes_per_row, 1))
    TM = min(tm_cap, tm_budget, _round_up(M, 8))
    TM = max(8, (TM // 8) * 8)

    grid_m = pl.cdiv(M, TM)  # ragged final block: Pallas masks the writeback

    x2d = x.reshape(M, size)
    # One-time tiny transpose (size*dim elems) -> kernel dot needs no per-step
    # relayout of the resident weight block.
    w_t = weight.T                      # (size, dim)
    b2d = bias.reshape(1, dim)

    cost = pl.CostEstimate(
        flops=2 * M * size * dim,
        transcendentals=0,
        bytes_accessed=(M * size + size * dim + dim + M * dim) * itemsize,
    )

    # Working set: double-buffered x/out tiles + (conservatively double-buffered)
    # resident weight and bias blocks.
    vmem_need = (2 * TM * size + 2 * TM * dim + 2 * size * dim + 2 * dim) * itemsize
    vmem_limit = int(min(max(2 * vmem_need, 16 * 1024 * 1024), 32 * 1024 * 1024))

    out = pl.pallas_call(
        _linear_kernel,
        out_shape=jax.ShapeDtypeStruct((M, dim), x.dtype),
        grid_spec=pltpu.PrefetchScalarGridSpec(
            num_scalar_prefetch=0,
            grid=(grid_m,),
            in_specs=[
                pl.BlockSpec((TM, size), lambda i: (i, 0)),   # x streamed over M
                pl.BlockSpec((size, dim), lambda i: (0, 0)),  # weight resident
                pl.BlockSpec((1, dim), lambda i: (0, 0)),     # bias resident
            ],
            out_specs=pl.BlockSpec((TM, dim), lambda i: (i, 0)),
        ),
        compiler_params=pltpu.CompilerParams(
            dimension_semantics=("parallel",),  # split row tiles across TCs (v7x)
            vmem_limit_bytes=vmem_limit,
        ),
        cost_estimate=cost,
    )(x2d, w_t, b2d)

    return out.reshape(*lead, dim)


if __name__ == "__main__":
    # Shapes implied by the module: (batch, seq, size) -> (batch, seq, dim)
    batch, seq, size, dim = 2, 8, 32, 64

    key = jax.random.PRNGKey(0)
    kx, kw, kb, kx2 = jax.random.split(key, 4)

    # Deterministic params (mimic nn.Linear uniform(-1/sqrt(size), 1/sqrt(size)))
    bound = 1.0 / (size ** 0.5)
    weight = jax.random.uniform(kw, (dim, size), jnp.float32, -bound, bound)
    bias = jax.random.uniform(kb, (dim,), jnp.float32, -bound, bound)

    # 1) Module-shaped input (M = 16, single grid step).
    x = jax.random.normal(kx, (batch, seq, size), jnp.float32)
    y = jax.block_until_ready(linear_embedding(x, weight, bias))
    y_ref = x @ weight.T + bias
    assert y.shape == (batch, seq, dim)
    assert jnp.allclose(y, y_ref, atol=1e-5, rtol=1e-5)

    # 2) Ragged / multi-step check: M = 21 with TM forced to 8 -> grid of 3 steps,
    #    last block only 5 valid rows (exercises Pallas masked writeback).
    x2 = jax.random.normal(kx2, (3, 7, size), jnp.float32)
    y2 = jax.block_until_ready(linear_embedding(x2, weight, bias, tm_cap=8))
    y2_ref = x2 @ weight.T + bias
    assert y2.shape == (3, 7, dim)
    assert jnp.allclose(y2, y2_ref, atol=1e-5, rtol=1e-5)

    print("KERNEL_OK")
</pallas_src>

<mosaic_0001>
module attributes {stable_mosaic.version = 11 : i64} {
  func.func @_linear_kernel(%arg0: i32, %arg1: memref<16x32xf32, #tpu.memory_space<vmem>>, %arg2: memref<32x64xf32, #tpu.memory_space<vmem>>, %arg3: memref<1x64xf32, #tpu.memory_space<vmem>>, %arg4: memref<16x64xf32, #tpu.memory_space<vmem>>) attributes {dimension_semantics = [#tpu.dimension_semantics<parallel>], iteration_bounds = array<i64: 1>, scalar_prefetch = 0 : i64, scratch_operands = 0 : i64, tpu.core_type = #tpu.core_type<tc>, window_params = [{transform_indices = @transform_0, window_bounds = array<i64: 16, 32>}, {pipeline_mode = #tpu.pipeline_mode<synchronous>, transform_indices = @transform_1, window_bounds = array<i64: 32, 64>}, {pipeline_mode = #tpu.pipeline_mode<synchronous>, transform_indices = @transform_2, window_bounds = array<i64: 1, 64>}, {transform_indices = @transform_3, window_bounds = array<i64: 16, 64>}]} {
    %c0 = arith.constant 0 : index
    %c0_0 = arith.constant 0 : index
    %0 = vector.load %arg1[%c0, %c0_0] : memref<16x32xf32, #tpu.memory_space<vmem>>, vector<16x32xf32>
    %c0_1 = arith.constant 0 : index
    %c0_2 = arith.constant 0 : index
    %1 = vector.load %arg2[%c0_1, %c0_2] : memref<32x64xf32, #tpu.memory_space<vmem>>, vector<32x64xf32>
    %cst = arith.constant dense<0.000000e+00> : vector<16x64xf32>
    %2 = tpu.matmul %0, %1, %cst {dimension_numbers = #tpu.dot_dimension_numbers<[1], [0], [0], [1], [0, 0, 1, 1], [], []>} : vector<16x32xf32>, vector<32x64xf32>, vector<16x64xf32> -> vector<16x64xf32>
    %c0_3 = arith.constant 0 : index
    %c0_4 = arith.constant 0 : index
    %3 = vector.load %arg3[%c0_3, %c0_4] : memref<1x64xf32, #tpu.memory_space<vmem>>, vector<1x64xf32>
    %4 = vector.broadcast %3 : vector<1x64xf32> to vector<16x64xf32>
    %5 = arith.addf %2, %4 : vector<16x64xf32>
    %c0_5 = arith.constant 0 : index
    %c0_6 = arith.constant 0 : index
    %6 = vector.load %arg4[%c0_5, %c0_6] : memref<16x64xf32, #tpu.memory_space<vmem>>, vector<16x64xf32>
    tpu.vector_store %arg4[%c0_5, %c0_6], %5 {strides = array<i32>} : memref<16x64xf32, #tpu.memory_space<vmem>>, vector<16x64xf32>,
    return
  }
  func.func @transform_0(%arg0: i32) -> (i32, i32) {
    %c0_i32 = arith.constant 0 : i32
    %c0_i32_0 = arith.constant 0 : i32
    return %arg0, %c0_i32 : i32, i32
  }
  func.func @transform_1(%arg0: i32) -> (i32, i32) {
    %c0_i32 = arith.constant 0 : i32
    %c0_i32_0 = arith.constant 0 : i32
    %c0_i32_1 = arith.constant 0 : i32
    return %c0_i32, %c0_i32_0 : i32, i32
  }
  func.func @transform_2(%arg0: i32) -> (i32, i32) {
    %c0_i32 = arith.constant 0 : i32
    %c0_i32_0 = arith.constant 0 : i32
    %c0_i32_1 = arith.constant 0 : i32
    return %c0_i32, %c0_i32_0 : i32, i32
  }
  func.func @transform_3(%arg0: i32) -> (i32, i32) {
    %c0_i32 = arith.constant 0 : i32
    %c0_i32_0 = arith.constant 0 : i32
    return %arg0, %c0_i32 : i32, i32
  }
}

</mosaic_0001>

<bundles_post_ra>
// kernel: tpu_custom_call.1
= control target key start
LH: loop header
LB: loop body
LE: loop exit
PB: predicated region body
PF: predicated region fallthrough
CT: control target
= control target key end

     0   :  { %8 = vsyncpa [#allocation3], 0  ;;  %s337_s0 = inlined_call_operand.hbm [shape: f32[16,32], index: 0, kind: input, shape index: {}]   ;;  %s338_s1 = inlined_call_operand.hbm [shape: f32[32,64], index: 1, kind: input, shape index: {}]   ;;  %s339_s2 = inlined_call_operand.vmem [shape: f32[1,64], index: 2, kind: input, shape index: {}]   ;;  %s340_s3 = inlined_call_operand.hbm [shape: f32[16,64], index: 3, kind: output, shape index: {}]  }
   0x1   :  { %9 = vsyncpa [#allocation6], 0 }
   0x2   :  { %10 = vsyncpa [#allocation4], 0  ;;  %s264_s12 = smov [#allocation2]   ;;  %s192_s16 = scalar_lea.hbm %s337_s0, 256 }
   0x3   :  { %s16_s13 = sshll.u32 %s264_s12, 4  ;;  %p193_p0 = scmp.ne.s32.totalorder %s337_s0, %s192_s16  ;;  %s17_s13 = int_to_ptr.vmem [resolvable:$true] %s16_s13 }
   0x4   :  { %p196_p1 = scmp.lt.u32.totalorder %s192_s16, %s337_s0 }
   0x6   :  { %p198_p2 = pnand %p196_p1, %p193_p0 }
   0x8   :  { %201 = shalt.err (!%p198_p2)
}
   0x9   :  { %s202_s21 = scalar_lea.vmem %s17_s13, 256  ;;  %p207_p4 = scmp.lt.s32.totalorder %s17_s13, %s17_s13 }
   0xa   :  { %p203_p3 = scmp.ne.s32.totalorder %s17_s13, %s202_s21  ;;  %p208_p5 = scmp.lt.s32.totalorder %s202_s21, %s202_s21 }
   0xc   :  { %p209_p6 = por %p208_p5, %p207_p4 }
   0xe   :  { %p210_p7 = pnand %p209_p6, %p203_p3 }
  0x10   :  { %213 = shalt.err (!%p210_p7)
}
  0x11   :  { %s265_s22 = smov 128   ;;  %s266_s23 = smov 8  }
  0x12   :  { %22 = dma.hbm_to_vmem [thread:$0]  %s337_s0, 256, %s17_s13, [#allocation3], %s265_s22, %s265_s22, %s266_s23  }
  0x13   :  { %s267_s26 = smov [#allocation5]   ;;  %s214_s30 = scalar_lea.hbm %s338_s1, 512 }
  0x14   :  { %s28_s27 = sshll.u32 %s267_s26, 4  ;;  %p215_p8 = scmp.ne.s32.totalorder %s338_s1, %s214_s30  ;;  %s29_s27 = int_to_ptr.vmem [resolvable:$true] %s28_s27 }
  0x15   :  { %p218_p9 = scmp.lt.u32.totalorder %s214_s30, %s338_s1 }
  0x17   :  { %p220_p10 = pnand %p218_p9, %p215_p8 }
  0x19   :  { %223 = shalt.err (!%p220_p10)
}
  0x1a   :  { %s224_s8 = scalar_lea.vmem %s29_s27, 512  ;;  %p229_p12 = scmp.lt.s32.totalorder %s29_s27, %s29_s27 }
  0x1b   :  { %p225_p11 = scmp.ne.s32.totalorder %s29_s27, %s224_s8  ;;  %p230_p13 = scmp.lt.s32.totalorder %s224_s8, %s224_s8 }
  0x1d   :  { %p231_p0 = por %p230_p13, %p229_p12 }
  0x1f   :  { %p232_p1 = pnand %p231_p0, %p225_p11 }
  0x21   :  { %235 = shalt.err (!%p232_p1)
}
  0x22   :  { %34 = dma.hbm_to_vmem [thread:$0]  %s338_s1, 512, %s29_s27, [#allocation6], %s265_s22, %s265_s22, %s266_s23  }
  0x23   :  { %258 = dma.done.wait [#allocation3], 256  }
  0x24   :  { %259 = vsyncadd [#allocation3], 4294967040 }
  0x25   :  { %260 = dma.done.wait [#allocation6], 512  }
  0x26   :  { %261 = vsyncadd [#allocation6], 4294966784  ;;  %vm56_vm0 = vcmask 261120   ;;  %v45_v0 = vld [vmem:[#allocation5] sm:$0xff]  ;;  %v46_v1 = vld [vmem:[#allocation5 + $0x8] sm:$0xff]  ;;  %s268_s11 = smov [#allocation7]  }
  0x27   :  { %v47_v2 = vld [vmem:[#allocation5 + $0x10] sm:$0xff]  ;;  %v179_v3 = vpack.c.bf16 %v46_v1, %v45_v0  ;;  %v48_v4 = vld [vmem:[#allocation5 + $0x18] sm:$0xff]  ;;  %s146_s12 = sshll.u32 %s268_s11, 4  ;;  %vm138_vm1 = vcmask 523264   ;;  %s147_s12 = int_to_ptr.vmem [resolvable:$true] %s146_s12 }
  0x28   :  { %v43_v5 = vld [vmem:[#allocation2] sm:$0xff]  ;;  %v183_v6 = vpack.c.bf16 %v48_v4, %v47_v2  ;;  %v44_v7 = vld [vmem:[#allocation2 + $0x8] sm:$0xff]  ;;  %s236_s13 = scalar_lea.vmem %s147_s12, 256  ;;  %p241_p3 = scmp.lt.s32.totalorder %s147_s12, %s147_s12 }
  0x29   :  { %176 = vmatprep.mubr.msk.f32.mxu0 %vm56_vm0, %v43_v5  ;;  %180 = vmatprep.subr.bf16.mxu0 %v179_v3  ;;  %v159_v8 = vld [vmem:[%s339_s2] ss:$0 sm:$0xff]  ;;  %p237_p2 = scmp.ne.s32.totalorder %s147_s12, %s236_s13  ;;  %p242_p4 = scmp.lt.s32.totalorder %s236_s13, %s236_s13 }
  0x2a   :  { %182 = vmatpush3.bf16.msra.mxu0 %v179_v3 }
  0x2b   :  { %184 = vmatprep.subr.bf16.mxu0 %v183_v6  ;;  %p243_p5 = por %p242_p4, %p241_p3 }
  0x2d   :  { %p244_p6 = pnand %p243_p5, %p237_p2 }
  0x2e   :  { %186 = vmatpush3.bf16.msra.mxu0 %v183_v6 }
  0x31   :  { %177 = vmatmul.mubr.msk.f32.vlgmr.msra.gmra.mrb[0].mxu0 %vm56_vm0, %v44_v7 }
 0x104   :  { %v178_v9 = vpop.f32.mrb[0].mxu0 }
 0x105   :  { %v135_v10 = vadd.f32 %v178_v9, %v159_v8  ;;  %v129_v11 = vpop.f32.mrb[1].mxu0 }
 0x106   :  { %v130_v12 = vadd.f32 %v159_v8, %v129_v11 }
 0x107   :  { %140 = vst.msk [vmem:[#allocation7 + $0x8] sm:$0xff] %vm138_vm1, %v135_v10 }
 0x108   :  { %139 = vst.msk [vmem:[#allocation7] sm:$0xff] %vm138_vm1, %v130_v12 }
 0x109   :  { %247 = shalt.err (!%p244_p6)
}
 0x10a   :  { %s248_s2 = scalar_lea.hbm %s340_s3, 256 }
 0x10b   :  { %p249_p7 = scmp.ne.s32.totalorder %s340_s3, %s248_s2  ;;  %p252_p8 = scmp.lt.u32.totalorder %s248_s2, %s340_s3 }
 0x10d   :  { %p254_p9 = pnand %p252_p8, %p249_p7 }
 0x10f   :  { %257 = shalt.err (!%p254_p9)
}
 0x110   :  { %152 = dma.vmem_to_hbm [thread:$0]  %s147_s12, 256, %s340_s3, [#allocation4], %s265_s22, %s265_s22, %s266_s23  }
 0x111   :  { %262 = dma.done.wait [#allocation4], 256  }
 0x112   :  { %263 = vsyncadd [#allocation4], 4294967040 }
 0x113   :  { %156 = vsyncpa [#allocation3], 1 }
 0x114   :  { %157 = vsyncpa [#allocation6], 1 }
 0x115   :  { %158 = vsyncpa [#allocation4], 1 }

</bundles_post_ra>
